<compile_context>
chip_gen: v7x
topology: tpu7x:2x2x1
jax: 0.10.0
libtpu: 0.0.40
codegen_flags: <defaults>
</compile_context>

<pallas_src>
import math

import jax
import jax.numpy as jnp
from jax.experimental import pallas as pl
from jax.experimental.pallas import tpu as pltpu


def make_pos_embedding(d_model: int, maxlen: int) -> jnp.ndarray:
    """Deterministic sinusoidal table, identical to the PyTorch __init__."""
    den = jnp.exp(-jnp.arange(0, d_model, 2, dtype=jnp.float32)
                  * math.log(10000.0) / d_model)              # (d_model/2,)
    pos = jnp.arange(0, maxlen, dtype=jnp.float32)[:, None]   # (maxlen, 1)
    angles = pos * den                                        # (maxlen, d_model/2)
    pe = jnp.zeros((maxlen, d_model), dtype=jnp.float32)
    pe = pe.at[:, 0::2].set(jnp.sin(angles))
    pe = pe.at[:, 1::2].set(jnp.cos(angles))
    return pe                                                 # (maxlen, d_model)


def _add_pe_kernel(x_ref, pe_ref, o_ref):
    # 2-D (TR, C) blocks; batch dim is squeezed out of the kernel's view.
    # Add in f32 (PE is kept f32 for parity with PyTorch's promotion rules),
    # cast once to the output dtype.
    o_ref[...] = (x_ref[...].astype(jnp.float32)
                  + pe_ref[...].astype(jnp.float32)).astype(o_ref.dtype)


def positional_encoding_forward(x: jnp.ndarray, pos_embedding: jnp.ndarray) -> jnp.ndarray:
    """x: (B, S, D); pos_embedding: (maxlen, D). Returns x + pe[:S] (broadcast over B)."""
    b, s, d = x.shape
    maxlen, d_pe = pos_embedding.shape
    assert d_pe == d, "pos_embedding d_model mismatch"
    assert s <= maxlen, "sequence length exceeds maxlen of the positional table"

    pe = pos_embedding[:s, :]                 # keep float32 (numerical parity)

    # ---- Lane densification: always present a 128-multiple last dim. -------
    pad_d = 0
    if d % 128 == 0:
        rows, cols = s, d
        x2 = x
        pe2 = pe
    elif (s * d) % 128 == 0:
        # Fold (S, D) -> (S*D/128, 128); x (per batch) and PE fold identically,
        # so the add stays element-for-element unchanged.
        rows, cols = (s * d) // 128, 128
        x2 = x.reshape(b, rows, cols)
        pe2 = pe.reshape(rows, cols)
    else:
        # Pad D up to the next multiple of 128 so stores are unmasked; slice
        # the padding off afterwards.
        pad_d = (-d) % 128
        rows, cols = s, d + pad_d
        x2 = jnp.pad(x, ((0, 0), (0, 0), (0, pad_d)))
        pe2 = jnp.pad(pe, ((0, 0), (0, pad_d)))

    # ---- Byte-budgeted row-tile size. ---------------------------------------
    itemsize = jnp.dtype(x.dtype).itemsize
    pack = {1: 32, 2: 16, 4: 8}.get(itemsize, 8)      # sublane packing per dtype

    # Target ~2 MiB per x block.  Pipeline footprint is roughly
    # 2*Bx (in) + 2*Bx (out) + 1*Bpe (Buffered(1), f32), i.e. ~10-12 MiB total,
    # which fits every generation's scoped-VMEM default (v5e 16 MiB, v6e/v7x
    # 32 MiB) and v7x's 64 MiB physical VMEM with headroom, while large enough
    # to amortize the ~0.35 us per-step overhead (~85% of HBM roofline).
    target_block_bytes = 2 * 1024 * 1024
    tr_cap = max(pack, (target_block_bytes // (cols * itemsize)) // pack * pack)

    if rows <= tr_cap:
        tr = rows                                     # full extent: always legal
    else:
        # Split rows evenly across tiles (avoids a tiny ragged last tile), then
        # round up to the sublane pack so the block shape stays (8,128)-legal.
        n_tiles = -(-rows // tr_cap)
        tr = -(-rows // n_tiles)
        tr = -(-tr // pack) * pack

    # Row-tile axis OUTER, batch INNER: the inner (fastest) axis leaves the PE
    # block index unchanged, so PE is fetched once per row-tile.
    grid = (pl.cdiv(rows, tr), b)

    out2 = pl.pallas_call(
        _add_pe_kernel,
        out_shape=jax.ShapeDtypeStruct((b, rows, cols), x.dtype),
        grid_spec=pltpu.PrefetchScalarGridSpec(
            num_scalar_prefetch=0,
            grid=grid,
            in_specs=[
                # x: one (TR, C) row-tile of one batch element per step.
                pl.BlockSpec((pl.Squeezed(), tr, cols), lambda ri, bi: (bi, ri, 0)),
                # PE table: constant over the inner batch axis -> DMAed once per
                # row-tile; single-buffered since it never changes mid-row-tile.
                pl.BlockSpec((tr, cols), lambda ri, bi: (ri, 0),
                             pipeline_mode=pl.Buffered(1)),
            ],
            out_specs=pl.BlockSpec((pl.Squeezed(), tr, cols),
                                   lambda ri, bi: (bi, ri, 0)),
        ),
        # Output reuses x2's buffer (same shape/dtype).  Donate x at the jit
        # boundary to actually elide the extra HBM allocation.
        input_output_aliases={0: 0},
        compiler_params=pltpu.CompilerParams(
            # Both axes independent -> shard across v7x's two TensorCores.
            dimension_semantics=("parallel", "parallel"),
            # Explicit, portable scoped-VMEM budget (>= the footprint above,
            # <= v7x's 64 MiB physical VMEM).
            vmem_limit_bytes=32 * 1024 * 1024,
        ),
    )(x2, pe2)

    if pad_d:
        return out2[:, :, :d]
    return out2.reshape(b, s, d)


if __name__ == "__main__":
    # Small shapes consistent with the module: batch=2, seq=8, d_model=32, maxlen=16.
    B, S, D, MAXLEN = 2, 8, 32, 16

    key = jax.random.PRNGKey(0)
    x = jax.random.normal(key, (B, S, D), dtype=jnp.float32)

    pos_embedding = make_pos_embedding(D, MAXLEN)

    # Reference (plain JAX) — same semantics as the PyTorch forward.
    ref = x + pos_embedding[None, :S, :]

    out = jax.jit(positional_encoding_forward)(x, pos_embedding)
    out = jax.block_until_ready(out)

    assert out.shape == (B, S, D)
    assert jnp.allclose(out, ref, atol=1e-6), "mismatch vs reference"

    print("KERNEL_OK")
</pallas_src>

<mosaic_0001>
module attributes {stable_mosaic.version = 11 : i64} {
  func.func @_add_pe_kernel(%arg0: i32, %arg1: i32, %arg2: memref<1x2x128xf32, #tpu.memory_space<vmem>>, %arg3: memref<2x128xf32, #tpu.memory_space<vmem>>, %arg4: memref<1x2x128xf32, #tpu.memory_space<vmem>>) attributes {dimension_semantics = [#tpu.dimension_semantics<parallel>, #tpu.dimension_semantics<parallel>], iteration_bounds = array<i64: 1, 2>, scalar_prefetch = 0 : i64, scratch_operands = 0 : i64, tpu.core_type = #tpu.core_type<tc>, window_params = [{transform_indices = @transform_0, window_bounds = array<i64: 1, 2, 128>}, {pipeline_mode = #tpu.pipeline_mode<synchronous>, transform_indices = @transform_1, window_bounds = array<i64: 2, 128>}, {transform_indices = @transform_2, window_bounds = array<i64: 1, 2, 128>}]} {
    %c0 = arith.constant 0 : index
    %c0_0 = arith.constant 0 : index
    %c0_1 = arith.constant 0 : index
    %0 = vector.load %arg2[%c0, %c0_0, %c0_1] : memref<1x2x128xf32, #tpu.memory_space<vmem>>, vector<1x2x128xf32>
    %1 = vector.shape_cast %0 : vector<1x2x128xf32> to vector<2x128xf32>
    %c0_2 = arith.constant 0 : index
    %c0_3 = arith.constant 0 : index
    %2 = vector.load %arg3[%c0_2, %c0_3] : memref<2x128xf32, #tpu.memory_space<vmem>>, vector<2x128xf32>
    %3 = arith.addf %1, %2 : vector<2x128xf32>
    %c0_4 = arith.constant 0 : index
    %c0_5 = arith.constant 0 : index
    %c0_6 = arith.constant 0 : index
    %4 = vector.load %arg4[%c0_4, %c0_5, %c0_6] : memref<1x2x128xf32, #tpu.memory_space<vmem>>, vector<1x2x128xf32>
    %5 = vector.shape_cast %4 : vector<1x2x128xf32> to vector<2x128xf32>
    %6 = vector.shape_cast %3 : vector<2x128xf32> to vector<1x2x128xf32>
    tpu.vector_store %arg4[%c0_4, %c0_5, %c0_6], %6 {strides = array<i32>} : memref<1x2x128xf32, #tpu.memory_space<vmem>>, vector<1x2x128xf32>,
    return
  }
  func.func @transform_0(%arg0: i32, %arg1: i32) -> (i32, i32, i32) {
    %c0_i32 = arith.constant 0 : i32
    %c0_i32_0 = arith.constant 0 : i32
    return %arg1, %arg0, %c0_i32 : i32, i32, i32
  }
  func.func @transform_1(%arg0: i32, %arg1: i32) -> (i32, i32) {
    %c0_i32 = arith.constant 0 : i32
    %c0_i32_0 = arith.constant 0 : i32
    return %arg0, %c0_i32 : i32, i32
  }
  func.func @transform_2(%arg0: i32, %arg1: i32) -> (i32, i32, i32) {
    %c0_i32 = arith.constant 0 : i32
    %c0_i32_0 = arith.constant 0 : i32
    return %arg1, %arg0, %c0_i32 : i32, i32, i32
  }
}

</mosaic_0001>

<bundles_post_ra>
// kernel: positional_encoding_forward.1
= control target key start
LH: loop header
LB: loop body
LE: loop exit
PB: predicated region body
PF: predicated region fallthrough
CT: control target
= control target key end

     0   :  { %s354_s9 = smov 0   ;;  %s331_s10 = smov 0   ;;  %s368_s0 = inlined_call_operand.vmem [shape: f32[2,2,128], index: 0, kind: input, shape index: {}, may-alias: {0,2}]   ;;  %s369_s1 = inlined_call_operand.vmem [shape: f32[2,128], index: 1, kind: input, shape index: {}]   ;;  %s370_s2 = inlined_call_operand.vmem [shape: f32[2,2,128], index: 2, kind: output, shape index: {}, may-alias: {0,2}]  }
   0x1   :  { %s335_s11 = smov 0  }
   0x2 LB: > { %s21_s12 = sadd.s32 1, %s333_s10  ;;  %p286_p0 = scmp.ge.s32.totalorder %s337_s11, 1  ;;  %s337_s11 = sphi %s335_s11, %s12_s11   ;;  %s333_s10 = sphi %s331_s10, %s332_s10   ;;  %s329_s9 = sphi %s354_s9, %s371_s9  }
   0x3   : > { %p22_p1 = scmp.ge.s32.totalorder %s21_s12, 2  ;;  %p139_p2 = scmp.lt.s32.totalorder %s337_s11, 3 }
   0x5   : > { %s373_s12 = smov (%p22_p1, %s21_s12), 0  ;;  %p140_p3 = pnand %p286_p0, %p139_p2 }
   0x6   : > { %p169_p4 = scmp.lt.s32.totalorder (!%p140_p3), %s329_s9, 1  ;;  %v188_v0 = vld [vmem:[%s369_s1] sm:$0x3] (!%p140_p3) }
   0x7   : > { %143 = sbr.rel (%p140_p3) target bundleno = 21 (0x15), region = 28 }
   0xe   : > { %s375_s9 = smov (!%p169_p4, %s329_s9), 1 }
   0xf   : > { %s287_s13 = sshll.u32 %s375_s9, 1 }
  0x10   : > { %s175_s18 = scalar_lea.vmem %s368_s0, %s287_s13  ;;  %s186_s21 = scalar_lea.vmem %s370_s2, %s287_s13 }
  0x11   : > { %v187_v1 = vld [vmem:[%s175_s18] sm:$0x3] }
  0x12   : > { %v189_v2 = vadd.f32 %v188_v0, %v187_v1 }
  0x14   : > { %190 = vst [vmem:[%s186_s21] sm:$0x3] %v189_v2 }
  0x15 PF: > { %s12_s11 = sadd.s32 1, %s337_s11   ;;  %s371_s9 = smov %s333_s10 }
  0x16   : > { %p9_p5 = scmp.ge.s32.totalorder %s12_s11, 4   ;;  %s332_s10 = smov %s373_s12  }
  0x18   :  { %11 = sbr.rel (!%p9_p5) target bundleno = 2 (0x2), region = 61 }

</bundles_post_ra>
